<compile_context>
chip_gen: v7x
topology: tpu7x:2x2x1
jax: 0.10.0
libtpu: 0.0.40
codegen_flags: <defaults>
</compile_context>

<pallas_src>
import jax
import jax.numpy as jnp
from jax.experimental import pallas as pl
from jax.experimental.pallas import tpu as pltpu


def _siamese_kernel(x_ref, w_ref, b_ref, o_ref):
    # x_ref: (m_block, K) f32 | w_ref: (K, H) bf16 | b_ref: (1, H) f32
    # o_ref: (m_block, H) f32
    x_bf16 = x_ref[...].astype(jnp.bfloat16)            # VPU cast of LHS rows
    acc = jnp.dot(x_bf16, w_ref[...],                   # MXU bf16 matmul,
                  preferred_element_type=jnp.float32)   # f32 accumulation
    o_ref[...] = jnp.maximum(acc + b_ref[...], 0.0)     # f32 bias+ReLU, lane-dense store


def _round_up(n, m):
    return (n + m - 1) // m * m


def _siamese_features(x2d, w, b):
    """ReLU(x2d @ W + b) for an (rows, K) activation slab.

    W is kept VMEM-resident across the row-block grid via a constant
    index_map; x/out blocks walk the rows.
    """
    rows, K = x2d.shape
    hidden = w.shape[1]

    # Fatten the MXU LHS: at least 16 rows (bf16 sublane packing); block at
    # 128 rows and walk a grid beyond that.
    m_block = _round_up(rows, 16) if rows <= 128 else 128
    rows_padded = _round_up(rows, m_block)
    if rows_padded != rows:
        x2d = jnp.pad(x2d, ((0, rows_padded - rows), (0, 0)))

    w_bf = w.astype(jnp.bfloat16)                    # no-op if stored bf16 at init
    b2d = b.reshape(1, hidden).astype(jnp.float32)

    grid = (rows_padded // m_block,)
    cost = pl.CostEstimate(
        flops=2 * rows_padded * K * hidden,
        bytes_accessed=(K * hidden * 2                 # W (bf16), DMA'd once
                        + rows_padded * K * 4          # x
                        + hidden * 4                   # b
                        + rows_padded * hidden * 4),   # out
        transcendentals=0,
    )

    out = pl.pallas_call(
        _siamese_kernel,
        out_shape=jax.ShapeDtypeStruct((rows_padded, hidden), jnp.float32),
        grid=grid,
        in_specs=[
            pl.BlockSpec((m_block, K), lambda i: (i, 0)),   # x walks row blocks
            pl.BlockSpec((K, hidden), lambda i: (0, 0)),    # W: VMEM-resident
            pl.BlockSpec((1, hidden), lambda i: (0, 0)),    # b: VMEM-resident
        ],
        out_specs=pl.BlockSpec((m_block, hidden), lambda i: (i, 0)),
        compiler_params=pltpu.CompilerParams(
            dimension_semantics=("parallel",)),             # v7x: 2 TCs
        cost_estimate=cost,
    )(x2d, w_bf, b2d)

    return out[:rows] if rows_padded != rows else out


def init_siamese_params(key, in_features, hidden):
    """One-time parameter init: W stored directly in bf16 (halves the weight
    DMA, which dominates this kernel's traffic); bias stays f32."""
    kw, kb = jax.random.split(key)
    w = (jax.random.normal(kw, (in_features, hidden), jnp.float32) * 0.02
         ).astype(jnp.bfloat16)
    b = jax.random.normal(kb, (hidden,), jnp.float32) * 0.1
    return w, b


@jax.jit
def my_siamese_1p(x, w, b):
    """Forward pass of mySiamese1P with a shared linear+ReLU feature net.

    x: (2, C, H, W)  -- two siamese branches, one sample each (module semantics)
    w: (C*H*W, hidden), preferably bf16; b: (hidden,)
    returns: (2 * hidden,) f32  ==  concat(o1, o2)
    """
    N = x.shape[0]
    assert N == 2, "mySiamese1P semantics require batch size 2 (one sample per branch)"
    K = x.shape[1] * x.shape[2] * x.shape[3]
    feats = _siamese_features(x.reshape(N, K), w, b)        # (2, hidden)
    # o[:dim1] = o1 ; o[dim1:] = o2  <=>  row-major flatten of the (2, hidden) block
    return feats.reshape(-1)


@jax.jit
def my_siamese_1p_batched(x, w, b):
    """Amortized path: many pairs in one pallas_call.

    x: (P, 2, C, H, W) -> (P, 2*hidden); row p is concat(o1_p, o2_p).
    """
    P = x.shape[0]
    assert x.shape[1] == 2
    K = x.shape[2] * x.shape[3] * x.shape[4]
    hidden = w.shape[1]
    feats = _siamese_features(x.reshape(P * 2, K), w, b)    # (2P, hidden)
    return feats.reshape(P, 2 * hidden)


if __name__ == "__main__":
    # Small shapes consistent with the module: batch=2 (split 1+1), C=4,
    # 16x16 spatial -> K = 1024.  hidden = 256 per review feedback (fills the
    # 256-wide MXU N dim on v6e/v7x; 2x128 lanes on v5e).
    N, C, H, W = 2, 4, 16, 16
    hidden = 256
    K = C * H * W

    key = jax.random.PRNGKey(0)
    kx, kp, kb = jax.random.split(key, 3)
    x = jax.random.normal(kx, (N, C, H, W), dtype=jnp.float32)
    w, b = init_siamese_params(kp, K, hidden)

    # --- single-pair path (original module semantics) ---
    o = my_siamese_1p(x, w, b)
    jax.block_until_ready(o)

    # Pure-JAX reference at the kernel's precision (bf16-rounded inputs,
    # f32 accumulation).
    w32 = w.astype(jnp.float32)
    x2d_ref = x.reshape(N, K).astype(jnp.bfloat16).astype(jnp.float32)
    feats = jnp.maximum(
        jnp.dot(x2d_ref, w32, precision=jax.lax.Precision.HIGHEST) + b, 0.0)
    ref = jnp.concatenate([feats[0], feats[1]])

    assert o.shape == (2 * hidden,)
    assert o.dtype == jnp.float32
    assert jnp.allclose(o, ref, atol=5e-3, rtol=5e-3), float(jnp.max(jnp.abs(o - ref)))

    # --- batched path: 80 pairs -> 160 rows -> 2 grid steps of 128 rows,
    #     weight DMA'd once and held VMEM-resident ---
    P = 80
    xb = jax.random.normal(kb, (P, 2, C, H, W), dtype=jnp.float32)
    ob = my_siamese_1p_batched(xb, w, b)
    jax.block_until_ready(ob)

    xb2d_ref = xb.reshape(P * 2, K).astype(jnp.bfloat16).astype(jnp.float32)
    featsb = jnp.maximum(
        jnp.dot(xb2d_ref, w32, precision=jax.lax.Precision.HIGHEST) + b, 0.0)
    refb = featsb.reshape(P, 2 * hidden)

    assert ob.shape == (P, 2 * hidden)
    assert ob.dtype == jnp.float32
    assert jnp.allclose(ob, refb, atol=5e-3, rtol=5e-3), float(jnp.max(jnp.abs(ob - refb)))

    print("KERNEL_OK")
</pallas_src>

<mosaic_0001>
module attributes {stable_mosaic.version = 11 : i64} {
  func.func @_siamese_kernel(%arg0: i32, %arg1: memref<16x1024xf32, #tpu.memory_space<vmem>>, %arg2: memref<1024x256xbf16, #tpu.memory_space<vmem>>, %arg3: memref<1x256xf32, #tpu.memory_space<vmem>>, %arg4: memref<16x256xf32, #tpu.memory_space<vmem>>) attributes {dimension_semantics = [#tpu.dimension_semantics<parallel>], iteration_bounds = array<i64: 1>, scalar_prefetch = 0 : i64, scratch_operands = 0 : i64, tpu.core_type = #tpu.core_type<tc>, window_params = [{transform_indices = @transform_0, window_bounds = array<i64: 16, 1024>}, {pipeline_mode = #tpu.pipeline_mode<synchronous>, transform_indices = @transform_1, window_bounds = array<i64: 1024, 256>}, {pipeline_mode = #tpu.pipeline_mode<synchronous>, transform_indices = @transform_2, window_bounds = array<i64: 1, 256>}, {transform_indices = @transform_3, window_bounds = array<i64: 16, 256>}]} {
    %c0 = arith.constant 0 : index
    %c0_0 = arith.constant 0 : index
    %0 = vector.load %arg1[%c0, %c0_0] : memref<16x1024xf32, #tpu.memory_space<vmem>>, vector<16x1024xf32>
    %1 = arith.truncf %0 : vector<16x1024xf32> to vector<16x1024xbf16>
    %c0_1 = arith.constant 0 : index
    %c0_2 = arith.constant 0 : index
    %2 = vector.load %arg2[%c0_1, %c0_2] : memref<1024x256xbf16, #tpu.memory_space<vmem>>, vector<1024x256xbf16>
    %cst = arith.constant dense<0.000000e+00> : vector<16x256xf32>
    %3 = tpu.matmul %1, %2, %cst {dimension_numbers = #tpu.dot_dimension_numbers<[1], [0], [0], [1], [0, 0, 1, 1], [], []>} : vector<16x1024xbf16>, vector<1024x256xbf16>, vector<16x256xf32> -> vector<16x256xf32>
    %c0_3 = arith.constant 0 : index
    %c0_4 = arith.constant 0 : index
    %4 = vector.load %arg3[%c0_3, %c0_4] : memref<1x256xf32, #tpu.memory_space<vmem>>, vector<1x256xf32>
    %5 = vector.broadcast %4 : vector<1x256xf32> to vector<16x256xf32>
    %6 = arith.addf %3, %5 : vector<16x256xf32>
    %cst_5 = arith.constant 0.000000e+00 : f32
    %7 = vector.broadcast %cst_5 : f32 to vector<16x256xf32>
    %8 = arith.maximumf %6, %7 : vector<16x256xf32>
    %c0_6 = arith.constant 0 : index
    %c0_7 = arith.constant 0 : index
    %9 = vector.load %arg4[%c0_6, %c0_7] : memref<16x256xf32, #tpu.memory_space<vmem>>, vector<16x256xf32>
    tpu.vector_store %arg4[%c0_6, %c0_7], %8 {strides = array<i32>} : memref<16x256xf32, #tpu.memory_space<vmem>>, vector<16x256xf32>,
    return
  }
  func.func @transform_0(%arg0: i32) -> (i32, i32) {
    %c0_i32 = arith.constant 0 : i32
    %c0_i32_0 = arith.constant 0 : i32
    return %arg0, %c0_i32 : i32, i32
  }
  func.func @transform_1(%arg0: i32) -> (i32, i32) {
    %c0_i32 = arith.constant 0 : i32
    %c0_i32_0 = arith.constant 0 : i32
    %c0_i32_1 = arith.constant 0 : i32
    return %c0_i32, %c0_i32_0 : i32, i32
  }
  func.func @transform_2(%arg0: i32) -> (i32, i32) {
    %c0_i32 = arith.constant 0 : i32
    %c0_i32_0 = arith.constant 0 : i32
    %c0_i32_1 = arith.constant 0 : i32
    return %c0_i32, %c0_i32_0 : i32, i32
  }
  func.func @transform_3(%arg0: i32) -> (i32, i32) {
    %c0_i32 = arith.constant 0 : i32
    %c0_i32_0 = arith.constant 0 : i32
    return %arg0, %c0_i32 : i32, i32
  }
}

</mosaic_0001>

<bundles_post_ra>
// kernel: my_siamese_1p.1
= control target key start
LH: loop header
LB: loop body
LE: loop exit
PB: predicated region body
PF: predicated region fallthrough
CT: control target
= control target key end

     0   :  { %8 = vsyncpa [#allocation3], 0  ;;  %s1380_s12 = smov [#allocation2]   ;;  %s1478_s0 = inlined_call_operand.vmem [shape: f32[16,1024], index: 0, kind: input, shape index: {}]   ;;  %s1479_s1 = inlined_call_operand.hbm [shape: bf16[1024,256], index: 1, kind: input, shape index: {}]   ;;  %s1480_s2 = inlined_call_operand.vmem [shape: f32[1,256], index: 2, kind: input, shape index: {}]   ;;  %s1481_s3 = inlined_call_operand.vmem [shape: f32[16,256], index: 3, kind: output, shape index: {}]  }
   0x1   :  { %s16_s13 = sshll.u32 %s1380_s12, 4  ;;  %s1356_s16 = scalar_lea.hbm %s1479_s1, 16384  ;;  %s17_s13 = int_to_ptr.vmem [resolvable:$true] %s16_s13 }
   0x2   :  { %p1357_p0 = scmp.ne.s32.totalorder %s1479_s1, %s1356_s16  ;;  %p1360_p1 = scmp.lt.u32.totalorder %s1356_s16, %s1479_s1 }
   0x4   :  { %p1362_p2 = pnand %p1360_p1, %p1357_p0 }
   0x6   :  { %1365 = shalt.err (!%p1362_p2)
}
   0x7   :  { %s1366_s21 = scalar_lea.vmem %s17_s13, 16384  ;;  %p1371_p4 = scmp.lt.s32.totalorder %s17_s13, %s17_s13 }
   0x8   :  { %p1367_p3 = scmp.ne.s32.totalorder %s17_s13, %s1366_s21  ;;  %p1372_p5 = scmp.lt.s32.totalorder %s1366_s21, %s1366_s21 }
   0xa   :  { %p1373_p6 = por %p1372_p5, %p1371_p4 }
   0xc   :  { %p1374_p7 = pnand %p1373_p6, %p1367_p3 }
   0xe   :  { %1377 = shalt.err (!%p1374_p7)
}
   0xf   :  { %s1381_s22 = smov 128   ;;  %s1382_s23 = smov 8  }
  0x10   :  { %22 = dma.hbm_to_vmem [thread:$0]  %s1479_s1, 16384, %s17_s13, [#allocation3], %s1381_s22, %s1381_s22, %s1382_s23  }
  0x11   :  { %1378 = dma.done.wait [#allocation3], 16384  }
  0x12   :  { %1379 = vsyncadd [#allocation3], 4294950912  ;;  %v1164_v0 = vld [vmem:[#allocation2 + $0x4] ss:$8 sps:$4 sm:$0xff]   ;;  %v1168_v2 = vld [vmem:[#allocation2] ss:$8 sps:$4 sm:$0xff]  }
  0x13   :  { %v1166_v1 = vld [vmem:[#allocation2 + $0x204] ss:$8 sps:$4 sm:$0xff]   ;;  %832 = vmatprep.subr.bf16.mxu1 %v1164_v0  ;;  %v1169_v3 = vld [vmem:[#allocation2 + $0x200] ss:$8 sps:$4 sm:$0xff]   ;;  %v1170_v4 = vld [vmem:[#allocation2 + $0x14] ss:$8 sps:$4 sm:$0xff]  }
  0x14   :  { %918 = vmatprep.subr.bf16.mxu0 %v1166_v1  ;;  %833 = vmatpush1.bf16.msra.mxu1 %v1168_v2  ;;  %v1172_v5 = vld [vmem:[#allocation2 + $0x214] ss:$8 sps:$4 sm:$0xff]   ;;  %v1174_v6 = vld [vmem:[#allocation2 + $0x10] ss:$8 sps:$4 sm:$0xff]   ;;  %v1176_v8 = vld [vmem:[#allocation2 + $0x24] ss:$8 sps:$4 sm:$0xff]  }
  0x15   :  { %919 = vmatpush1.bf16.msra.mxu0 %v1169_v3  ;;  %834 = vmatprep.subr.bf16.mxu1 %v1170_v4  ;;  %v1175_v7 = vld [vmem:[#allocation2 + $0x210] ss:$8 sps:$4 sm:$0xff]   ;;  %v1178_v9 = vld [vmem:[#allocation2 + $0x224] ss:$8 sps:$4 sm:$0xff]   ;;  %v1180_v10 = vld [vmem:[#allocation2 + $0x20] ss:$8 sps:$4 sm:$0xff]  }
  0x16   :  { %920 = vmatprep.subr.bf16.mxu0 %v1172_v5  ;;  %v1181_v11 = vld [vmem:[#allocation2 + $0x220] ss:$8 sps:$4 sm:$0xff]   ;;  %v1182_v12 = vld [vmem:[#allocation2 + $0x34] ss:$8 sps:$4 sm:$0xff]   ;;  %v1186_v14 = vld [vmem:[#allocation2 + $0x30] ss:$8 sps:$4 sm:$0xff]  }
  0x17   :  { %v1184_v13 = vld [vmem:[#allocation2 + $0x234] ss:$8 sps:$4 sm:$0xff]   ;;  %v1187_v15 = vld [vmem:[#allocation2 + $0x230] ss:$8 sps:$4 sm:$0xff]   ;;  %v1188_v16 = vld [vmem:[#allocation2 + $0x44] ss:$8 sps:$4 sm:$0xff]  }
  0x18   :  { %835 = vmatpush1.bf16.msra.mxu1 %v1174_v6  ;;  %v1190_v17 = vld [vmem:[#allocation2 + $0x244] ss:$8 sps:$4 sm:$0xff]   ;;  %v1192_v18 = vld [vmem:[#allocation2 + $0x40] ss:$8 sps:$4 sm:$0xff]   ;;  %v1194_v20 = vld [vmem:[#allocation2 + $0x54] ss:$8 sps:$4 sm:$0xff]  }
  0x19   :  { %921 = vmatpush1.bf16.msra.mxu0 %v1175_v7  ;;  %836 = vmatprep.subr.bf16.mxu1 %v1176_v8  ;;  %v1193_v19 = vld [vmem:[#allocation2 + $0x240] ss:$8 sps:$4 sm:$0xff]   ;;  %v1196_v21 = vld [vmem:[#allocation2 + $0x254] ss:$8 sps:$4 sm:$0xff]   ;;  %v1198_v22 = vld [vmem:[#allocation2 + $0x50] ss:$8 sps:$4 sm:$0xff]  }
  0x1a   :  { %922 = vmatprep.subr.bf16.mxu0 %v1178_v9  ;;  %v1199_v23 = vld [vmem:[#allocation2 + $0x250] ss:$8 sps:$4 sm:$0xff]   ;;  %v1200_v24 = vld [vmem:[#allocation2 + $0x64] ss:$8 sps:$4 sm:$0xff]   ;;  %v1204_v26 = vld [vmem:[#allocation2 + $0x60] ss:$8 sps:$4 sm:$0xff]  }
  0x1b   :  { %v1202_v25 = vld [vmem:[#allocation2 + $0x264] ss:$8 sps:$4 sm:$0xff]   ;;  %v1205_v27 = vld [vmem:[#allocation2 + $0x260] ss:$8 sps:$4 sm:$0xff]   ;;  %v1206_v28 = vld [vmem:[#allocation2 + $0x74] ss:$8 sps:$4 sm:$0xff]  }
  0x1c   :  { %837 = vmatpush1.bf16.msra.mxu1 %v1180_v10  ;;  %v1208_v29 = vld [vmem:[#allocation2 + $0x274] ss:$8 sps:$4 sm:$0xff]   ;;  %v1210_v30 = vld [vmem:[#allocation2 + $0x70] ss:$8 sps:$4 sm:$0xff]   ;;  %v1212_v32 = vld [vmem:[#allocation2 + $0x84] ss:$8 sps:$4 sm:$0xff]  }
  0x1d   :  { %923 = vmatpush1.bf16.msra.mxu0 %v1181_v11  ;;  %838 = vmatprep.subr.bf16.mxu1 %v1182_v12  ;;  %v1211_v31 = vld [vmem:[#allocation2 + $0x270] ss:$8 sps:$4 sm:$0xff]   ;;  %v1214_v33 = vld [vmem:[#allocation2 + $0x284] ss:$8 sps:$4 sm:$0xff]   ;;  %v1216_v34 = vld [vmem:[#allocation2 + $0x80] ss:$8 sps:$4 sm:$0xff]  }
  0x1e   :  { %924 = vmatprep.subr.bf16.mxu0 %v1184_v13  ;;  %v1217_v35 = vld [vmem:[#allocation2 + $0x280] ss:$8 sps:$4 sm:$0xff]   ;;  %v1218_v36 = vld [vmem:[#allocation2 + $0x94] ss:$8 sps:$4 sm:$0xff]   ;;  %v1222_v38 = vld [vmem:[#allocation2 + $0x90] ss:$8 sps:$4 sm:$0xff]  }
  0x1f   :  { %v1220_v37 = vld [vmem:[#allocation2 + $0x294] ss:$8 sps:$4 sm:$0xff]   ;;  %v1223_v39 = vld [vmem:[#allocation2 + $0x290] ss:$8 sps:$4 sm:$0xff]   ;;  %v1224_v40 = vld [vmem:[#allocation2 + $0xa4] ss:$8 sps:$4 sm:$0xff]  }
  0x20   :  { %839 = vmatpush1.bf16.msra.mxu1 %v1186_v14  ;;  %v1226_v41 = vld [vmem:[#allocation2 + $0x2a4] ss:$8 sps:$4 sm:$0xff]   ;;  %v1228_v42 = vld [vmem:[#allocation2 + $0xa0] ss:$8 sps:$4 sm:$0xff]   ;;  %v1230_v44 = vld [vmem:[#allocation2 + $0xb4] ss:$8 sps:$4 sm:$0xff]  }
  0x21   :  { %925 = vmatpush1.bf16.msra.mxu0 %v1187_v15  ;;  %840 = vmatprep.subr.bf16.mxu1 %v1188_v16  ;;  %v1229_v43 = vld [vmem:[#allocation2 + $0x2a0] ss:$8 sps:$4 sm:$0xff]   ;;  %v1232_v45 = vld [vmem:[#allocation2 + $0x2b4] ss:$8 sps:$4 sm:$0xff]   ;;  %v1234_v46 = vld [vmem:[#allocation2 + $0xb0] ss:$8 sps:$4 sm:$0xff]  }
  0x22   :  { %926 = vmatprep.subr.bf16.mxu0 %v1190_v17  ;;  %v1235_v47 = vld [vmem:[#allocation2 + $0x2b0] ss:$8 sps:$4 sm:$0xff]   ;;  %v29_v48 = vld [vmem:[%s1478_s0 + $0x8] sm:$0xff]  ;;  %v1242_v58 = vld [vmem:[#allocation2 + $0xd4] ss:$8 sps:$4 sm:$0xff]  }
  0x23   :  { %v37_v49 = vld [vmem:[%s1478_s0 + $0x48] sm:$0xff]  ;;  %v1244_v59 = vld [vmem:[#allocation2 + $0x2d4] ss:$8 sps:$4 sm:$0xff]   ;;  %v1246_v60 = vld [vmem:[#allocation2 + $0xd0] ss:$8 sps:$4 sm:$0xff]  }
  0x24   :  { %841 = vmatpush1.bf16.msra.mxu1 %v1192_v18  ;;  %v1236_v50 = vld [vmem:[#allocation2 + $0xc4] ss:$8 sps:$4 sm:$0xff]   ;;  %v45_v52 = vpack.c.bf16 %v37_v49, %v29_v48  ;;  %v1240_v56 = vld [vmem:[#allocation2 + $0xc0] ss:$8 sps:$4 sm:$0xff]   ;;  %v1247_v61 = vld [vmem:[#allocation2 + $0x2d0] ss:$8 sps:$4 sm:$0xff]  }
  0x25   :  { %927 = vmatpush1.bf16.msra.mxu0 %v1193_v19  ;;  %842 = vmatprep.subr.bf16.mxu1 %v1194_v20  ;;  %v1238_v51 = vld [vmem:[#allocation2 + $0x2c4] ss:$8 sps:$4 sm:$0xff]   ;;  %v1241_v57 = vld [vmem:[#allocation2 + $0x2c0] ss:$8 sps:$4 sm:$0xff]   ;;  %v1254_v2 = vld [vmem:[#allocation2 + $0xf4] ss:$8 sps:$4 sm:$0xff]  }
  0x26   :  { %928 = vmatprep.subr.bf16.mxu0 %v1196_v21  ;;  %v33_v53 = vld [vmem:[%s1478_s0 + $0x28] sm:$0xff]  ;;  %864 = vmatprep.mubr.bf16.mxu1 %v45_v52  ;;  %v1256_v3 = vld [vmem:[#allocation2 + $0x2f4] ss:$8 sps:$4 sm:$0xff]   ;;  %v1258_v4 = vld [vmem:[#allocation2 + $0xf0] ss:$8 sps:$4 sm:$0xff]  }
  0x27   :  { %v41_v54 = vld [vmem:[%s1478_s0 + $0x68] sm:$0xff]  ;;  %v1259_v5 = vld [vmem:[#allocation2 + $0x2f0] ss:$8 sps:$4 sm:$0xff]   ;;  %v28_v6 = vld [vmem:[%s1478_s0] sm:$0xff] }
  0x28   :  { %843 = vmatpush1.bf16.msra.mxu1 %v1198_v22  ;;  %v49_v55 = vpack.c.bf16 %v41_v54, %v33_v53  ;;  %v1248_v62 = vld [vmem:[#allocation2 + $0xe4] ss:$8 sps:$4 sm:$0xff]   ;;  %v1252_v0 = vld [vmem:[#allocation2 + $0xe0] ss:$8 sps:$4 sm:$0xff]   ;;  %v1268_v16 = vld [vmem:[#allocation2 + $0x114] ss:$8 sps:$4 sm:$0xff]  }
  0x29   :  { %929 = vmatpush1.bf16.msra.mxu0 %v1199_v23  ;;  %844 = vmatprep.subr.bf16.mxu1 %v1200_v24  ;;  %v1250_v63 = vld [vmem:[#allocation2 + $0x2e4] ss:$8 sps:$4 sm:$0xff]   ;;  %v1253_v1 = vld [vmem:[#allocation2 + $0x2e0] ss:$8 sps:$4 sm:$0xff]   ;;  %v1271_v17 = vld [vmem:[#allocation2 + $0x314] ss:$8 sps:$4 sm:$0xff]  }
  0x2a   :  { %930 = vmatprep.subr.bf16.mxu0 %v1202_v25  ;;  %950 = vmatprep.mubr.bf16.mxu0 %v49_v55  ;;  %v1262_v7 = vld [vmem:[#allocation2 + $0x104] ss:$8 sps:$4 sm:$0xff]   ;;  %v1260_v12 = vld [vmem:[#allocation2 + $0x100] ss:$8 sps:$4 sm:$0xff]   ;;  %v1266_v18 = vld [vmem:[#allocation2 + $0x110] ss:$8 sps:$4 sm:$0xff]  }
  0x2b   :  { %v36_v8 = vld [vmem:[%s1478_s0 + $0x40] sm:$0xff]  ;;  %v1269_v19 = vld [vmem:[#allocation2 + $0x310] ss:$8 sps:$4 sm:$0xff]   ;;  %v1280_v24 = vld [vmem:[#allocation2 + $0x134] ss:$8 sps:$4 sm:$0xff]  }
  0x2c   :  { %845 = vmatpush1.bf16.msra.mxu1 %v1204_v26  ;;  %v32_v9 = vld [vmem:[%s1478_s0 + $0x20] sm:$0xff]  ;;  %v44_v14 = vpack.c.bf16 %v36_v8, %v28_v6  ;;  %v1283_v25 = vld [vmem:[#allocation2 + $0x334] ss:$8 sps:$4 sm:$0xff]   ;;  %v1278_v26 = vld [vmem:[#allocation2 + $0x130] ss:$8 sps:$4 sm:$0xff]  }
  0x2d   :  { %931 = vmatpush1.bf16.msra.mxu0 %v1205_v27  ;;  %846 = vmatprep.subr.bf16.mxu1 %v1206_v28  ;;  %v40_v10 = vld [vmem:[%s1478_s0 + $0x60] sm:$0xff]  ;;  %v1281_v27 = vld [vmem:[#allocation2 + $0x330] ss:$8 sps:$4 sm:$0xff]   ;;  %v1316_v54 = vld [vmem:[#allocation2 + $0x194] ss:$8 sps:$4 sm:$0xff]  }
  0x2e   :  { %932 = vmatprep.subr.bf16.mxu0 %v1208_v29  ;;  %v1265_v11 = vld [vmem:[#allocation2 + $0x304] ss:$8 sps:$4 sm:$0xff]   ;;  %v1263_v13 = vld [vmem:[#allocation2 + $0x300] ss:$8 sps:$4 sm:$0xff]   ;;  %v48_v15 = vpack.c.bf16 %v40_v10, %v32_v9  ;;  %v1302_v48 = vld [vmem:[#allocation2 + $0x170] ss:$8 sps:$4 sm:$0xff]  }
  0x2f   :  { %v1274_v20 = vld [vmem:[#allocation2 + $0x124] ss:$8 sps:$4 sm:$0xff]   ;;  %v1272_v22 = vld [vmem:[#allocation2 + $0x120] ss:$8 sps:$4 sm:$0xff]   ;;  %v1305_v49 = vld [vmem:[#allocation2 + $0x370] ss:$8 sps:$4 sm:$0xff]  }
  0x30   :  { %847 = vmatpush1.bf16.msra.mxu1 %v1210_v30  ;;  %v1277_v21 = vld [vmem:[#allocation2 + $0x324] ss:$8 sps:$4 sm:$0xff]   ;;  %v1275_v23 = vld [vmem:[#allocation2 + $0x320] ss:$8 sps:$4 sm:$0xff]   ;;  %v1319_v55 = vld [vmem:[#allocation2 + $0x394] ss:$8 sps:$4 sm:$0xff]  }
  0x31   :  { %933 = vmatpush1.bf16.msra.mxu0 %v1211_v31  ;;  %848 = vmatprep.subr.bf16.mxu1 %v1212_v32  ;;  %v1286_v28 = vld [vmem:[#allocation2 + $0x144] ss:$8 sps:$4 sm:$0xff]   ;;  %v1284_v30 = vld [vmem:[#allocation2 + $0x140] ss:$8 sps:$4 sm:$0xff]   ;;  %v1292_v32 = vld [vmem:[#allocation2 + $0x154] ss:$8 sps:$4 sm:$0xff]  }
  0x32   :  { %934 = vmatprep.subr.bf16.mxu0 %v1214_v33  ;;  %v1289_v29 = vld [vmem:[#allocation2 + $0x344] ss:$8 sps:$4 sm:$0xff]   ;;  %v1287_v31 = vld [vmem:[#allocation2 + $0x340] ss:$8 sps:$4 sm:$0xff]   ;;  %v1295_v33 = vld [vmem:[#allocation2 + $0x354] ss:$8 sps:$4 sm:$0xff]  }
  0x33   :  { %v1308_v52 = vld [vmem:[#allocation2 + $0x180] ss:$8 sps:$4 sm:$0xff]   ;;  %v1340_v6 = vld [vmem:[#allocation2 + $0x1d4] ss:$8 sps:$4 sm:$0xff]   ;;  %v1338_v8 = vld [vmem:[#allocation2 + $0x1d0] ss:$8 sps:$4 sm:$0xff]  }
  0x34   :  { %849 = vmatpush1.bf16.msra.mxu1 %v1216_v34  ;;  %v1290_v34 = vld [vmem:[#allocation2 + $0x150] ss:$8 sps:$4 sm:$0xff]   ;;  %v1311_v53 = vld [vmem:[#allocation2 + $0x380] ss:$8 sps:$4 sm:$0xff]   ;;  %v1346_v10 = vld [vmem:[#allocation2 + $0x1e4] ss:$8 sps:$4 sm:$0xff]  }
  0x35   :  { %935 = vmatpush1.bf16.msra.mxu0 %v1217_v35  ;;  %850 = vmatprep.subr.bf16.mxu1 %v1218_v36  ;;  %v1293_v35 = vld [vmem:[#allocation2 + $0x350] ss:$8 sps:$4 sm:$0xff]   ;;  %v1298_v36 = vld [vmem:[#allocation2 + $0x164] ss:$8 sps:$4 sm:$0xff]  }
  0x36   :  { %936 = vmatprep.subr.bf16.mxu0 %v1220_v37  ;;  %v1301_v37 = vld [vmem:[#allocation2 + $0x364] ss:$8 sps:$4 sm:$0xff]   ;;  %v1341_v9 = vld [vmem:[#allocation2 + $0x3d0] ss:$8 sps:$4 sm:$0xff]  }
  0x38   :  { %851 = vmatpush1.bf16.msra.mxu1 %v1222_v38  ;;  %v1296_v38 = vld [vmem:[#allocation2 + $0x160] ss:$8 sps:$4 sm:$0xff]  }
  0x39   :  { %937 = vmatpush1.bf16.msra.mxu0 %v1223_v39  ;;  %852 = vmatprep.subr.bf16.mxu1 %v1224_v40  ;;  %v1299_v39 = vld [vmem:[#allocation2 + $0x360] ss:$8 sps:$4 sm:$0xff]   ;;  %v31_v40 = vld [vmem:[%s1478_s0 + $0x18] sm:$0xff] }
  0x3a   :  { %938 = vmatprep.subr.bf16.mxu0 %v1226_v41  ;;  %v39_v41 = vld [vmem:[%s1478_s0 + $0x58] sm:$0xff] }
  0x3c   :  { %853 = vmatpush1.bf16.msra.mxu1 %v1228_v42  ;;  %v35_v42 = vld [vmem:[%s1478_s0 + $0x38] sm:$0xff] }
  0x3d   :  { %939 = vmatpush1.bf16.msra.mxu0 %v1229_v43  ;;  %854 = vmatprep.subr.bf16.mxu1 %v1230_v44  ;;  %v1304_v43 = vld [vmem:[#allocation2 + $0x174] ss:$8 sps:$4 sm:$0xff]  }
  0x3e   :  { %940 = vmatprep.subr.bf16.mxu0 %v1232_v45  ;;  %v1307_v44 = vld [vmem:[#allocation2 + $0x374] ss:$8 sps:$4 sm:$0xff]   ;;  %v47_v45 = vpack.c.bf16 %v39_v41, %v31_v40 }
  0x40   :  { %855 = vmatpush1.bf16.msra.mxu1 %v1234_v46  ;;  %v43_v46 = vld [vmem:[%s1478_s0 + $0x78] sm:$0xff] }
  0x41   :  { %941 = vmatpush1.bf16.msra.mxu0 %v1235_v47  ;;  %856 = vmatprep.subr.bf16.mxu1 %v1236_v50  ;;  %v51_v47 = vpack.c.bf16 %v43_v46, %v35_v42  ;;  %v1310_v50 = vld [vmem:[#allocation2 + $0x184] ss:$8 sps:$4 sm:$0xff]  }
  0x42   :  { %942 = vmatprep.subr.bf16.mxu0 %v1238_v51  ;;  %v1313_v51 = vld [vmem:[#allocation2 + $0x384] ss:$8 sps:$4 sm:$0xff]  }
  0x44   :  { %857 = vmatpush1.bf16.msra.mxu1 %v1240_v56  ;;  %v1314_v56 = vld [vmem:[#allocation2 + $0x190] ss:$8 sps:$4 sm:$0xff]  }
  0x45   :  { %943 = vmatpush1.bf16.msra.mxu0 %v1241_v57  ;;  %858 = vmatprep.subr.bf16.mxu1 %v1242_v58  ;;  %v1317_v57 = vld [vmem:[#allocation2 + $0x390] ss:$8 sps:$4 sm:$0xff]   ;;  %v1322_v58 = vld [vmem:[#allocation2 + $0x1a4] ss:$8 sps:$4 sm:$0xff]  }
  0x46   :  { %944 = vmatprep.subr.bf16.mxu0 %v1244_v59  ;;  %v1325_v59 = vld [vmem:[#allocation2 + $0x3a4] ss:$8 sps:$4 sm:$0xff]  }
  0x48   :  { %859 = vmatpush1.bf16.msra.mxu1 %v1246_v60  ;;  %v1320_v60 = vld [vmem:[#allocation2 + $0x1a0] ss:$8 sps:$4 sm:$0xff]  }
  0x49   :  { %945 = vmatpush1.bf16.msra.mxu0 %v1247_v61  ;;  %860 = vmatprep.subr.bf16.mxu1 %v1248_v62  ;;  %v1323_v61 = vld [vmem:[#allocation2 + $0x3a0] ss:$8 sps:$4 sm:$0xff]   ;;  %v1328_v62 = vld [vmem:[#allocation2 + $0x1b4] ss:$8 sps:$4 sm:$0xff]  }
  0x4a   :  { %946 = vmatprep.subr.bf16.mxu0 %v1250_v63  ;;  %v1331_v63 = vld [vmem:[#allocation2 + $0x3b4] ss:$8 sps:$4 sm:$0xff]  }
  0x4c   :  { %861 = vmatpush1.bf16.msra.mxu1 %v1252_v0  ;;  %v1326_v0 = vld [vmem:[#allocation2 + $0x1b0] ss:$8 sps:$4 sm:$0xff]  }
  0x4d   :  { %947 = vmatpush1.bf16.msra.mxu0 %v1253_v1  ;;  %862 = vmatprep.subr.bf16.mxu1 %v1254_v2  ;;  %v1329_v1 = vld [vmem:[#allocation2 + $0x3b0] ss:$8 sps:$4 sm:$0xff]   ;;  %v1334_v2 = vld [vmem:[#allocation2 + $0x1c4] ss:$8 sps:$4 sm:$0xff]  }
  0x4e   :  { %948 = vmatprep.subr.bf16.mxu0 %v1256_v3  ;;  %v1337_v3 = vld [vmem:[#allocation2 + $0x3c4] ss:$8 sps:$4 sm:$0xff]  }
  0x50   :  { %863 = vmatpush1.bf16.msra.mxu1 %v1258_v4  ;;  %v1332_v4 = vld [vmem:[#allocation2 + $0x1c0] ss:$8 sps:$4 sm:$0xff]  }
  0x51   :  { %949 = vmatpush1.bf16.msra.mxu0 %v1259_v5  ;;  %875 = vmatprep.subr.bf16.mxu1 %v1262_v7  ;;  %v1335_v5 = vld [vmem:[#allocation2 + $0x3c0] ss:$8 sps:$4 sm:$0xff]   ;;  %v1343_v7 = vld [vmem:[#allocation2 + $0x3d4] ss:$8 sps:$4 sm:$0xff]  }
  0x52   :  { %961 = vmatprep.subr.bf16.mxu0 %v1265_v11  ;;  %v1349_v11 = vld [vmem:[#allocation2 + $0x3e4] ss:$8 sps:$4 sm:$0xff]  }
  0x53   :  { %865 = vmatmul.mubr.bf16.vlgmr.msra.gmra.mrb[0].mxu1 %v44_v14  ;;  %v1352_v14 = vld [vmem:[#allocation2 + $0x1f4] ss:$8 sps:$4 sm:$0xff]  }
  0x54   :  { %951 = vmatmul.mubr.bf16.vlgmr.msra.gmra.mrb[0].mxu0 %v48_v15  ;;  %876 = vmatpush1.bf16.msra.mxu1 %v1260_v12  ;;  %v1344_v12 = vld [vmem:[#allocation2 + $0x1e0] ss:$8 sps:$4 sm:$0xff]   ;;  %v1355_v15 = vld [vmem:[#allocation2 + $0x3f4] ss:$8 sps:$4 sm:$0xff]  }
  0x55   :  { %962 = vmatpush1.bf16.msra.mxu0 %v1263_v13  ;;  %877 = vmatprep.subr.bf16.mxu1 %v1268_v16  ;;  %v1347_v13 = vld [vmem:[#allocation2 + $0x3e0] ss:$8 sps:$4 sm:$0xff]   ;;  %v1350_v16 = vld [vmem:[#allocation2 + $0x1f0] ss:$8 sps:$4 sm:$0xff]  }
  0x56   :  { %963 = vmatprep.subr.bf16.mxu0 %v1271_v17  ;;  %907 = vmatprep.mubr.bf16.mxu1 %v47_v45  ;;  %v1353_v17 = vld [vmem:[#allocation2 + $0x3f0] ss:$8 sps:$4 sm:$0xff]  }
  0x57   :  { %993 = vmatprep.mubr.bf16.mxu0 %v51_v47 }
  0x58   :  { %878 = vmatpush1.bf16.msra.mxu1 %v1266_v18  ;;  %v30_v18 = vld [vmem:[%s1478_s0 + $0x10] sm:$0xff] }
  0x59   :  { %964 = vmatpush1.bf16.msra.mxu0 %v1269_v19  ;;  %879 = vmatprep.subr.bf16.mxu1 %v1274_v20  ;;  %v38_v19 = vld [vmem:[%s1478_s0 + $0x50] sm:$0xff] }
  0x5a   :  { %965 = vmatprep.subr.bf16.mxu0 %v1277_v21  ;;  %v34_v20 = vld [vmem:[%s1478_s0 + $0x30] sm:$0xff] }
  0x5b   :  { %v42_v21 = vld [vmem:[%s1478_s0 + $0x70] sm:$0xff] }
  0x5c   :  { %880 = vmatpush1.bf16.msra.mxu1 %v1272_v22  ;;  %v46_v22 = vpack.c.bf16 %v38_v19, %v30_v18 }
  0x5d   :  { %966 = vmatpush1.bf16.msra.mxu0 %v1275_v23  ;;  %881 = vmatprep.subr.bf16.mxu1 %v1280_v24  ;;  %v50_v23 = vpack.c.bf16 %v42_v21, %v34_v20  ;;  %v182_v24 = vlaneseq }
  0x5e   :  { %967 = vmatprep.subr.bf16.mxu0 %v1283_v25 }
  0x5f   :  { %v183_v25 = vshrl.u32 %v182_v24, 7 }
  0x60   :  { %882 = vmatpush1.bf16.msra.mxu1 %v1278_v26 }
  0x61   :  { %968 = vmatpush1.bf16.msra.mxu0 %v1281_v27  ;;  %883 = vmatprep.subr.bf16.mxu1 %v1286_v28  ;;  %v184_v26 = vsub.s32 0, %v183_v25  ;;  %v180_v27 = vld [vmem:[%s1480_s2] sm:$0x3]  ;;  %v188_v28 = vsub.s32 1, %v183_v25 }
  0x62   :  { %969 = vmatprep.subr.bf16.mxu0 %v1289_v29 }
  0x63   :  { %v185_v29 = vrot.slane %v180_v27, %v184_v26 }
  0x64   :  { %884 = vmatpush1.bf16.msra.mxu1 %v1284_v30  ;;  %v189_v30 = vrot.slane %v180_v27, %v188_v28 }
  0x65   :  { %970 = vmatpush1.bf16.msra.mxu0 %v1287_v31  ;;  %885 = vmatprep.subr.bf16.mxu1 %v1292_v32 }
  0x66   :  { %971 = vmatprep.subr.bf16.mxu0 %v1295_v33 }
  0x68   :  { %886 = vmatpush1.bf16.msra.mxu1 %v1290_v34 }
  0x69   :  { %972 = vmatpush1.bf16.msra.mxu0 %v1293_v35  ;;  %887 = vmatprep.subr.bf16.mxu1 %v1298_v36 }
  0x6a   :  { %973 = vmatprep.subr.bf16.mxu0 %v1301_v37 }
  0x6c   :  { %888 = vmatpush1.bf16.msra.mxu1 %v1296_v38 }
  0x6d   :  { %974 = vmatpush1.bf16.msra.mxu0 %v1299_v39  ;;  %889 = vmatprep.subr.bf16.mxu1 %v1304_v43 }
  0x6e   :  { %975 = vmatprep.subr.bf16.mxu0 %v1307_v44 }
  0x70   :  { %890 = vmatpush1.bf16.msra.mxu1 %v1302_v48 }
  0x71   :  { %976 = vmatpush1.bf16.msra.mxu0 %v1305_v49  ;;  %891 = vmatprep.subr.bf16.mxu1 %v1310_v50 }
  0x72   :  { %977 = vmatprep.subr.bf16.mxu0 %v1313_v51 }
  0x74   :  { %892 = vmatpush1.bf16.msra.mxu1 %v1308_v52 }
  0x75   :  { %978 = vmatpush1.bf16.msra.mxu0 %v1311_v53  ;;  %893 = vmatprep.subr.bf16.mxu1 %v1316_v54 }
  0x76   :  { %979 = vmatprep.subr.bf16.mxu0 %v1319_v55 }
  0x78   :  { %894 = vmatpush1.bf16.msra.mxu1 %v1314_v56 }
  0x79   :  { %980 = vmatpush1.bf16.msra.mxu0 %v1317_v57  ;;  %895 = vmatprep.subr.bf16.mxu1 %v1322_v58 }
  0x7a   :  { %981 = vmatprep.subr.bf16.mxu0 %v1325_v59 }
  0x7c   :  { %896 = vmatpush1.bf16.msra.mxu1 %v1320_v60 }
  0x7d   :  { %982 = vmatpush1.bf16.msra.mxu0 %v1323_v61  ;;  %897 = vmatprep.subr.bf16.mxu1 %v1328_v62 }
  0x7e   :  { %983 = vmatprep.subr.bf16.mxu0 %v1331_v63 }
  0x80   :  { %898 = vmatpush1.bf16.msra.mxu1 %v1326_v0 }
  0x81   :  { %984 = vmatpush1.bf16.msra.mxu0 %v1329_v1  ;;  %899 = vmatprep.subr.bf16.mxu1 %v1334_v2 }
  0x82   :  { %985 = vmatprep.subr.bf16.mxu0 %v1337_v3 }
  0x84   :  { %900 = vmatpush1.bf16.msra.mxu1 %v1332_v4 }
  0x85   :  { %986 = vmatpush1.bf16.msra.mxu0 %v1335_v5  ;;  %901 = vmatprep.subr.bf16.mxu1 %v1340_v6 }
  0x86   :  { %987 = vmatprep.subr.bf16.mxu0 %v1343_v7 }
  0x88   :  { %902 = vmatpush1.bf16.msra.mxu1 %v1338_v8 }
  0x89   :  { %988 = vmatpush1.bf16.msra.mxu0 %v1341_v9  ;;  %903 = vmatprep.subr.bf16.mxu1 %v1346_v10 }
  0x8a   :  { %989 = vmatprep.subr.bf16.mxu0 %v1349_v11 }
  0x8c   :  { %904 = vmatpush1.bf16.msra.mxu1 %v1344_v12 }
  0x8d   :  { %990 = vmatpush1.bf16.msra.mxu0 %v1347_v13  ;;  %905 = vmatprep.subr.bf16.mxu1 %v1352_v14 }
  0x8e   :  { %991 = vmatprep.subr.bf16.mxu0 %v1355_v15 }
  0x90   :  { %906 = vmatpush1.bf16.msra.mxu1 %v1350_v16 }
  0x91   :  { %992 = vmatpush1.bf16.msra.mxu0 %v1353_v17 }
  0x93   :  { %908 = vmatmul.mubr.bf16.vlgmr.msra.gmra.mrb[0].mxu1 %v46_v22 }
  0x94   :  { %994 = vmatmul.mubr.bf16.vlgmr.msra.gmra.mrb[0].mxu0 %v50_v23 }
 0x166   :  { %v909_v31 = vpop.f32.mrb[0].mxu1 }
 0x167   :  { %v995_v32 = vpop.f32.mrb[0].mxu0  ;;  %v1145_v33 = vadd.f32 %v909_v31, %v185_v29  ;;  %v911_v34 = vpop.f32.mrb[1].mxu1 }
 0x168   :  { %v997_v35 = vpop.f32.mrb[1].mxu0  ;;  %v1147_v36 = vadd.f32 %v911_v34, %v189_v30  ;;  %v913_v37 = vpop.f32.mrb[2].mxu1 }
 0x169   :  { %v999_v38 = vpop.f32.mrb[2].mxu0  ;;  %v1146_v39 = vadd.f32 %v1145_v33, %v995_v32  ;;  %v1149_v40 = vadd.f32 %v913_v37, %v185_v29  ;;  %v915_v41 = vpop.f32.mrb[3].mxu1 }
 0x16a   :  { %v1001_v42 = vpop.f32.mrb[3].mxu0  ;;  %v1148_v43 = vadd.f32 %v1147_v36, %v997_v35  ;;  %v1151_v44 = vadd.f32 %v915_v41, %v189_v30 }
 0x16b   :  { %v1004_v45 = vmax.f32 %v1146_v39, 0.0  ;;  %v1150_v46 = vadd.f32 %v1149_v40, %v999_v38 }
 0x16c   :  { %v1005_v47 = vmax.f32 %v1148_v43, 0.0  ;;  %v1152_v48 = vadd.f32 %v1151_v44, %v1001_v42 }
 0x16d   :  { %1008 = vst [vmem:[%s1481_s3] sm:$0xff] %v1004_v45  ;;  %v1006_v49 = vmax.f32 %v1150_v46, 0.0 }
 0x16e   :  { %1009 = vst [vmem:[%s1481_s3 + $0x8] sm:$0xff] %v1005_v47  ;;  %v1007_v50 = vmax.f32 %v1152_v48, 0.0 }
 0x16f   :  { %1010 = vst [vmem:[%s1481_s3 + $0x10] sm:$0xff] %v1006_v49 }
 0x170   :  { %1011 = vst [vmem:[%s1481_s3 + $0x18] sm:$0xff] %v1007_v50 }
 0x171   :  { %1016 = vsyncpa [#allocation3], 1 }

</bundles_post_ra>
